<compile_context>
chip_gen: v5e
topology: v5e:2x2
jax: 0.10.0
libtpu: 0.0.40
codegen_flags: <defaults>
</compile_context>

<pallas_src>
import math

import jax
import jax.numpy as jnp
from jax import lax
from jax.experimental import pallas as pl
from jax.experimental.pallas import tpu as pltpu

_LANES = 128
_SUBLANES = 8
_MAX_TILE_ROWS = 2048          # (2048, 128) f32 tile = 1 MiB per input buffer
_LN2 = math.log(2.0)


def _cdiv(a: int, b: int) -> int:
    return -(-a // b)


def _round_up(a: int, b: int) -> int:
    return _cdiv(a, b) * b


def _num_tensorcores() -> int:
    # v7x has 2 TensorCores per chip; v5e / v6e have 1.
    try:
        kind = jax.devices()[0].device_kind.lower()
    except Exception:
        return 1
    return 2 if "v7" in kind else 1


def _make_kernel(rows, tile_rows, blocks_per_core, first_masked_block, needs_mask):
    groups = tile_rows // _SUBLANES

    def kernel(pred_ref, tgt_ref, sum_ref, cnt_ref):
        c = pl.program_id(0)   # core-split axis ("parallel")
        k = pl.program_id(1)   # reduction axis ("arbitrary")

        @pl.when(k == 0)
        def _init():
            sum_ref[...] = jnp.zeros_like(sum_ref)
            cnt_ref[...] = jnp.zeros_like(cnt_ref)

        def accumulate(mask_rows):
            t = tgt_ref[...].astype(jnp.float32)
            p = pred_ref[...].astype(jnp.float32)
            valid = t > 0.0
            if mask_rows:
                # Only the edge block pays for the iota / range mask.
                blk = c * blocks_per_core + k
                row_ids = blk * tile_rows + lax.broadcasted_iota(
                    jnp.int32, (tile_rows, _LANES), 0)
                valid = jnp.logical_and(valid, row_ids < rows)

            a = jnp.abs(t - p)
            # Stable log(cosh(x)) + ln2 = |x| + log1p(exp(-2|x|)); the -ln2
            # is hoisted into the wrapper (mean is affine in it).
            lc = a + jnp.log1p(jnp.exp(-2.0 * a))

            # NOTE: keep jnp.where (not lc * valid) so NaN/Inf from garbage
            # rows of a partial block are discarded, never propagated.
            contrib = jnp.where(valid, lc, 0.0)
            vf = valid.astype(jnp.float32)

            # (8,128)-tile-aligned fold down to a single vreg accumulator:
            # pure vreg-to-vreg VPU adds, no XLU, tiny resident output.
            sum_ref[...] += jnp.sum(
                contrib.reshape(groups, _SUBLANES, _LANES), axis=0)
            cnt_ref[...] += jnp.sum(
                vf.reshape(groups, _SUBLANES, _LANES), axis=0)

        if needs_mask:
            blk = c * blocks_per_core + k
            is_edge = blk >= first_masked_block

            @pl.when(blk < first_masked_block)
            def _steady():
                accumulate(False)

            @pl.when(is_edge)
            def _edge():
                accumulate(True)
        else:
            accumulate(False)

    return kernel


def log_cosh_loss(pred: jax.Array, target: jax.Array) -> jax.Array:
    assert pred.ndim == target.ndim, "inconsistent dimensions"
    assert pred.shape == target.shape, "inconsistent shapes"

    pred_f = pred.reshape(-1)
    tgt_f = target.reshape(-1)
    n = pred_f.shape[0]

    # Tiny-input fallback: pallas_call + follow-up reduce overhead can't win.
    if n < _SUBLANES * _LANES:
        mask = tgt_f > 0
        a = jnp.abs(jnp.where(mask, tgt_f - pred_f, 0.0).astype(jnp.float32))
        lc = a + jnp.log1p(jnp.exp(-2.0 * a)) - _LN2
        return jnp.sum(jnp.where(mask, lc, 0.0)) / jnp.sum(
            mask.astype(jnp.float32))

    # Pad only the sub-128 lane tail; padded target == 0 is excluded by the
    # (target > 0) validity mask, so no extra masking is needed for it.
    rem = n % _LANES
    if rem:
        pad = _LANES - rem
        pred_f = jnp.pad(pred_f, (0, pad))
        tgt_f = jnp.pad(tgt_f, (0, pad))

    rows = pred_f.shape[0] // _LANES
    pred2d = pred_f.reshape(rows, _LANES)
    tgt2d = tgt_f.reshape(rows, _LANES)

    # Generation-aware core split: only v7x has 2 TensorCores.
    ncores = _num_tensorcores()
    if rows < 2 * _SUBLANES * ncores:
        ncores = 1

    blocks_per_core = max(1, _cdiv(rows, ncores * _MAX_TILE_ROWS))
    num_blocks = ncores * blocks_per_core
    tile_rows = _round_up(_cdiv(rows, num_blocks), _SUBLANES)

    last_data_block = (rows - 1) // tile_rows          # last block with real rows
    needs_mask = num_blocks * tile_rows > rows          # some block overruns `rows`
    needs_clamp = last_data_block < num_blocks - 1      # degenerate: fully-empty block(s)
    first_masked_block = rows // tile_rows

    if needs_clamp:
        def in_index(c, k):
            # Safety net only (degenerate tiny-remainder cases); the masked
            # edge path zeroes any duplicated block's contribution.
            return (jnp.minimum(c * blocks_per_core + k, last_data_block), 0)
    else:
        def in_index(c, k):
            return (c * blocks_per_core + k, 0)

    in_spec = pl.BlockSpec((tile_rows, _LANES), in_index)
    if ncores == 2:
        # Deeper input pipelining on v7x, where per-step DMA time is smallest.
        try:
            in_spec = pl.BlockSpec((tile_rows, _LANES), in_index,
                                   pipeline_mode=pl.Buffered(3))
        except Exception:
            pass
    out_spec = pl.BlockSpec((None, _SUBLANES, _LANES), lambda c, k: (c, 0, 0))

    in_bytes = (jnp.dtype(pred.dtype).itemsize + jnp.dtype(target.dtype).itemsize)
    tile_bytes = tile_rows * _LANES * max(jnp.dtype(pred.dtype).itemsize,
                                          jnp.dtype(target.dtype).itemsize)
    vmem_limit = int(min(32 << 20, max(8 << 20, 6 * tile_bytes + (2 << 20))))

    cost = pl.CostEstimate(flops=12 * n, transcendentals=2 * n,
                           bytes_accessed=n * in_bytes)

    sum_out, cnt_out = pl.pallas_call(
        _make_kernel(rows, tile_rows, blocks_per_core,
                     first_masked_block, needs_mask),
        out_shape=(
            jax.ShapeDtypeStruct((ncores, _SUBLANES, _LANES), jnp.float32),
            jax.ShapeDtypeStruct((ncores, _SUBLANES, _LANES), jnp.float32),
        ),
        grid_spec=pltpu.PrefetchScalarGridSpec(
            num_scalar_prefetch=0,
            grid=(ncores, blocks_per_core),
            in_specs=[in_spec, in_spec],
            out_specs=(out_spec, out_spec),
        ),
        compiler_params=pltpu.CompilerParams(
            dimension_semantics=("parallel", "arbitrary"),
            vmem_limit_bytes=vmem_limit,
        ),
        cost_estimate=cost,
    )(pred2d, tgt2d)

    # Single cross-lane reduce + divide, done once; -ln2 hoisted out of the
    # kernel. Count == 0 -> NaN, matching torch .mean() over empty selection.
    return jnp.sum(sum_out) / jnp.sum(cnt_out) - _LN2


def _reference(pred, target):
    mask = target > 0
    diff = jnp.where(mask, target - pred, 0.0)
    lc = jnp.where(mask, jnp.log(jnp.cosh(diff)), 0.0)
    return jnp.sum(lc) / jnp.sum(mask.astype(jnp.float32))


if __name__ == "__main__":
    key = jax.random.PRNGKey(0)
    k1, k2, k3, k4 = jax.random.split(key, 4)

    # NCHW input like the PyTorch module; ~half the targets are <= 0 so the
    # validity mask actually does work.
    shape = (2, 4, 16, 16)
    pred = jax.random.normal(k1, shape, dtype=jnp.float32)
    target = jax.random.normal(k2, shape, dtype=jnp.float32)

    loss = log_cosh_loss(pred, target)
    jax.block_until_ready(loss)
    ref = _reference(pred, target)
    assert jnp.allclose(loss, ref, rtol=1e-4, atol=1e-5), (loss, ref)

    # Second shape exercising the lane-tail padding and the masked edge block.
    shape2 = (2, 3, 33, 65)
    pred2 = jax.random.normal(k3, shape2, dtype=jnp.float32)
    target2 = jax.random.normal(k4, shape2, dtype=jnp.float32)
    loss2 = log_cosh_loss(pred2, target2)
    jax.block_until_ready(loss2)
    ref2 = _reference(pred2, target2)
    assert jnp.allclose(loss2, ref2, rtol=1e-4, atol=1e-5), (loss2, ref2)

    print("KERNEL_OK")
</pallas_src>

<mosaic_0001>
module attributes {stable_mosaic.version = 11 : i64} {
  func.func @kernel(%arg0: i32, %arg1: i32, %arg2: memref<16x128xf32, #tpu.memory_space<vmem>>, %arg3: memref<16x128xf32, #tpu.memory_space<vmem>>, %arg4: memref<1x8x128xf32, #tpu.memory_space<vmem>>, %arg5: memref<1x8x128xf32, #tpu.memory_space<vmem>>) attributes {dimension_semantics = [#tpu.dimension_semantics<parallel>, #tpu.dimension_semantics<arbitrary>], iteration_bounds = array<i64: 1, 1>, scalar_prefetch = 0 : i64, scratch_operands = 0 : i64, tpu.core_type = #tpu.core_type<tc>, window_params = [{transform_indices = @transform_0, window_bounds = array<i64: 16, 128>}, {transform_indices = @transform_1, window_bounds = array<i64: 16, 128>}, {transform_indices = @transform_2, window_bounds = array<i64: 1, 8, 128>}, {transform_indices = @transform_3, window_bounds = array<i64: 1, 8, 128>}]} {
    %c0_i32 = arith.constant 0 : i32
    %0 = arith.cmpi eq, %arg1, %c0_i32 : i32
    %1 = arith.extui %0 : i1 to i32
    %c0_i32_0 = arith.constant 0 : i32
    %2 = arith.cmpi ne, %1, %c0_i32_0 : i32
    scf.if %2 {
      %cst_20 = arith.constant 0.000000e+00 : f32
      %34 = vector.broadcast %cst_20 : f32 to vector<8x128xf32>
      %c0_21 = arith.constant 0 : index
      %c0_22 = arith.constant 0 : index
      %c0_23 = arith.constant 0 : index
      %35 = vector.load %arg4[%c0_21, %c0_22, %c0_23] : memref<1x8x128xf32, #tpu.memory_space<vmem>>, vector<1x8x128xf32>
      %36 = vector.shape_cast %35 : vector<1x8x128xf32> to vector<8x128xf32>
      %37 = vector.shape_cast %34 : vector<8x128xf32> to vector<1x8x128xf32>
      tpu.vector_store %arg4[%c0_21, %c0_22, %c0_23], %37 {strides = array<i32>} : memref<1x8x128xf32, #tpu.memory_space<vmem>>, vector<1x8x128xf32>,
      %cst_24 = arith.constant 0.000000e+00 : f32
      %38 = vector.broadcast %cst_24 : f32 to vector<8x128xf32>
      %c0_25 = arith.constant 0 : index
      %c0_26 = arith.constant 0 : index
      %c0_27 = arith.constant 0 : index
      %39 = vector.load %arg5[%c0_25, %c0_26, %c0_27] : memref<1x8x128xf32, #tpu.memory_space<vmem>>, vector<1x8x128xf32>
      %40 = vector.shape_cast %39 : vector<1x8x128xf32> to vector<8x128xf32>
      %41 = vector.shape_cast %38 : vector<8x128xf32> to vector<1x8x128xf32>
      tpu.vector_store %arg5[%c0_25, %c0_26, %c0_27], %41 {strides = array<i32>} : memref<1x8x128xf32, #tpu.memory_space<vmem>>, vector<1x8x128xf32>,
    } else {
    }
    %c0 = arith.constant 0 : index
    %c0_1 = arith.constant 0 : index
    %3 = vector.load %arg3[%c0, %c0_1] : memref<16x128xf32, #tpu.memory_space<vmem>>, vector<16x128xf32>
    %c0_2 = arith.constant 0 : index
    %c0_3 = arith.constant 0 : index
    %4 = vector.load %arg2[%c0_2, %c0_3] : memref<16x128xf32, #tpu.memory_space<vmem>>, vector<16x128xf32>
    %cst = arith.constant 0.000000e+00 : f32
    %5 = vector.broadcast %cst : f32 to vector<16x128xf32>
    %6 = arith.cmpf ogt, %3, %5 : vector<16x128xf32>
    %7 = arith.subf %3, %4 : vector<16x128xf32>
    %8 = math.absf %7 : vector<16x128xf32>
    %cst_4 = arith.constant -2.000000e+00 : f32
    %9 = vector.broadcast %cst_4 : f32 to vector<16x128xf32>
    %10 = arith.mulf %9, %8 : vector<16x128xf32>
    %11 = math.exp %10 : vector<16x128xf32>
    %12 = math.log1p %11 : vector<16x128xf32>
    %13 = arith.addf %8, %12 : vector<16x128xf32>
    %cst_5 = arith.constant 0.000000e+00 : f32
    %14 = vector.broadcast %cst_5 : f32 to vector<16x128xf32>
    %15 = arith.select %6, %13, %14 : vector<16x128xi1>, vector<16x128xf32>
    %16 = arith.extui %6 : vector<16x128xi1> to vector<16x128xi32>
    %17 = arith.sitofp %16 : vector<16x128xi32> to vector<16x128xf32>
    %c0_6 = arith.constant 0 : index
    %c0_7 = arith.constant 0 : index
    %c0_8 = arith.constant 0 : index
    %18 = vector.load %arg4[%c0_6, %c0_7, %c0_8] : memref<1x8x128xf32, #tpu.memory_space<vmem>>, vector<1x8x128xf32>
    %19 = vector.shape_cast %18 : vector<1x8x128xf32> to vector<8x128xf32>
    %20 = vector.shape_cast %15 : vector<16x128xf32> to vector<2x8x128xf32>
    %cst_9 = arith.constant dense<0.000000e+00> : vector<8x128xf32>
    %21 = vector.multi_reduction <add>, %20, %cst_9 [0] : vector<2x8x128xf32> to vector<8x128xf32>
    %22 = arith.addf %19, %21 : vector<8x128xf32>
    %c0_10 = arith.constant 0 : index
    %c0_11 = arith.constant 0 : index
    %c0_12 = arith.constant 0 : index
    %23 = vector.load %arg4[%c0_10, %c0_11, %c0_12] : memref<1x8x128xf32, #tpu.memory_space<vmem>>, vector<1x8x128xf32>
    %24 = vector.shape_cast %23 : vector<1x8x128xf32> to vector<8x128xf32>
    %25 = vector.shape_cast %22 : vector<8x128xf32> to vector<1x8x128xf32>
    tpu.vector_store %arg4[%c0_10, %c0_11, %c0_12], %25 {strides = array<i32>} : memref<1x8x128xf32, #tpu.memory_space<vmem>>, vector<1x8x128xf32>,
    %c0_13 = arith.constant 0 : index
    %c0_14 = arith.constant 0 : index
    %c0_15 = arith.constant 0 : index
    %26 = vector.load %arg5[%c0_13, %c0_14, %c0_15] : memref<1x8x128xf32, #tpu.memory_space<vmem>>, vector<1x8x128xf32>
    %27 = vector.shape_cast %26 : vector<1x8x128xf32> to vector<8x128xf32>
    %28 = vector.shape_cast %17 : vector<16x128xf32> to vector<2x8x128xf32>
    %cst_16 = arith.constant dense<0.000000e+00> : vector<8x128xf32>
    %29 = vector.multi_reduction <add>, %28, %cst_16 [0] : vector<2x8x128xf32> to vector<8x128xf32>
    %30 = arith.addf %27, %29 : vector<8x128xf32>
    %c0_17 = arith.constant 0 : index
    %c0_18 = arith.constant 0 : index
    %c0_19 = arith.constant 0 : index
    %31 = vector.load %arg5[%c0_17, %c0_18, %c0_19] : memref<1x8x128xf32, #tpu.memory_space<vmem>>, vector<1x8x128xf32>
    %32 = vector.shape_cast %31 : vector<1x8x128xf32> to vector<8x128xf32>
    %33 = vector.shape_cast %30 : vector<8x128xf32> to vector<1x8x128xf32>
    tpu.vector_store %arg5[%c0_17, %c0_18, %c0_19], %33 {strides = array<i32>} : memref<1x8x128xf32, #tpu.memory_space<vmem>>, vector<1x8x128xf32>,
    return
  }
  func.func @transform_0(%arg0: i32, %arg1: i32) -> (i32, i32) {
    %c1_i32 = arith.constant 1 : i32
    %0 = arith.muli %arg0, %c1_i32 : i32
    %1 = arith.addi %0, %arg1 : i32
    %c0_i32 = arith.constant 0 : i32
    %c0_i32_0 = arith.constant 0 : i32
    return %1, %c0_i32 : i32, i32
  }
  func.func @transform_1(%arg0: i32, %arg1: i32) -> (i32, i32) {
    %c1_i32 = arith.constant 1 : i32
    %0 = arith.muli %arg0, %c1_i32 : i32
    %1 = arith.addi %0, %arg1 : i32
    %c0_i32 = arith.constant 0 : i32
    %c0_i32_0 = arith.constant 0 : i32
    return %1, %c0_i32 : i32, i32
  }
  func.func @transform_2(%arg0: i32, %arg1: i32) -> (i32, i32, i32) {
    %c0_i32 = arith.constant 0 : i32
    %c0_i32_0 = arith.constant 0 : i32
    %c0_i32_1 = arith.constant 0 : i32
    return %arg0, %c0_i32, %c0_i32_0 : i32, i32, i32
  }
  func.func @transform_3(%arg0: i32, %arg1: i32) -> (i32, i32, i32) {
    %c0_i32 = arith.constant 0 : i32
    %c0_i32_0 = arith.constant 0 : i32
    %c0_i32_1 = arith.constant 0 : i32
    return %arg0, %c0_i32, %c0_i32_0 : i32, i32, i32
  }
}

</mosaic_0001>

<bundles_post_ra>
// kernel: tpu_custom_call.1
= control target key start
LH: loop header
LB: loop body
LE: loop exit
PB: predicated region body
PF: predicated region fallthrough
CT: control target
= control target key end

     0   :  { %9 = vsyncpa [#allocation3], 0  ;;  %s313_s0 = inlined_call_operand.hbm [shape: f32[16,128], index: 0, kind: input, shape index: {}]   ;;  %s314_s1 = inlined_call_operand.hbm [shape: f32[16,128], index: 1, kind: input, shape index: {}]   ;;  %s315_s2 = inlined_call_operand.hbm [shape: f32[1,8,128], index: 2, kind: output, shape index: {0}]   ;;  %s316_s3 = inlined_call_operand.hbm [shape: f32[1,8,128], index: 3, kind: output, shape index: {1}]  }
   0x1   :  { %10 = vsyncpa [#allocation6], 0 }
   0x2   :  { %11 = vsyncpa [#allocation4], 0 }
   0x3   :  { %12 = vsyncpa [#allocation9], 0  ;;  %s21_s14 = sshll.u32 %s313_s0, 4  ;;  %s270_s15 = smov [#allocation2]   ;;  %s22_s14 = int_to_ptr.hbm [resolvable:$true] %s21_s14 }
   0x4   :  { %s23_s16 = sshll.u32 %s270_s15, 4  ;;  %s38_s19 = sshll.u32 %s314_s1, 4  ;;  %s24_s16 = int_to_ptr.vmem [resolvable:$true] %s23_s16  ;;  %s39_s19 = int_to_ptr.hbm [resolvable:$true] %s38_s19 }
   0x5   :  { %s271_s20 = smov 128   ;;  %s272_s21 = smov 8  }
   0x6   :  { %29 = dma.hbm_to_vmem [thread:$0]  %s22_s14, 256, %s24_s16, [#allocation3], %s271_s20, %s271_s20, %s272_s21  }
   0x7   :  { %s273_s22 = smov [#allocation5]  }
   0x8   :  { %s40_s23 = sshll.u32 %s273_s22, 4  ;;  %s41_s23 = int_to_ptr.vmem [resolvable:$true] %s40_s23 }
   0x9   :  { %46 = dma.hbm_to_vmem [thread:$0]  %s39_s19, 256, %s41_s23, [#allocation6], %s271_s20, %s271_s20, %s272_s21  }
   0xa   :  { %262 = dma.done.wait [#allocation3], 256  }
   0xb   :  { %263 = vsyncadd [#allocation3], 4294967040 }
   0xc   :  { %264 = dma.done.wait [#allocation6], 256  }
   0xd   :  { %265 = vsyncadd [#allocation6], 4294967040  ;;  %v65_v0 = vld [vmem:[#allocation5] sm:$0xff]  ;;  %v66_v1 = vld [vmem:[#allocation5 + $0x8] sm:$0xff]  ;;  %v274_v6 = vmov 0.0   ;;  %s275_s0 = smov [#allocation8]  }
   0xe   :  { %v67_v2 = vld [vmem:[#allocation2] sm:$0xff]  ;;  %v68_v3 = vld [vmem:[#allocation2 + $0x8] sm:$0xff]  ;;  %vm69_vm0 = vcmp.gt.f32.partialorder %v65_v0, 0.0  ;;  %vm70_vm1 = vcmp.gt.f32.partialorder %v66_v1, 0.0  ;;  %s131_s1 = sshll.u32 %s275_s0, 4  ;;  %s133_s26 = sshll.u32 %s316_s3, 4  ;;  %s132_s1 = int_to_ptr.vmem [resolvable:$true] %s131_s1  ;;  %s134_s26 = int_to_ptr.hbm [resolvable:$true] %s133_s26 }
   0xf   :  { %v71_v4 = vsub.f32 %v65_v0, %v67_v2  ;;  %v72_v5 = vsub.f32 %v66_v1, %v68_v3  ;;  %v149_v7 = vsel %vm69_vm0, 1.0, %v274_v6  ;;  %v150_v8 = vsel %vm70_vm1, 1.0, %v274_v6  ;;  %s276_s3 = smov [#allocation7]   ;;  %s122_s30 = sshll.u32 %s315_s2, 4  ;;  %s123_s30 = int_to_ptr.hbm [resolvable:$true] %s122_s30 }
  0x10   :  { %v112_v10 = vadd.f32 %v150_v8, %v149_v7  ;;  %s120_s27 = sshll.u32 %s276_s3, 4  ;;  %s121_s27 = int_to_ptr.vmem [resolvable:$true] %s120_s27 }
  0x11   :  { %v73_v9 = vand.u32 2147483647, %v71_v4  ;;  %v74_v11 = vand.u32 2147483647, %v72_v5 }
  0x12   :  { %114 = vst [vmem:[#allocation8] sm:$0xff] %v112_v10 }
  0x13   :  { %v75_v12 = vmul.f32 -2.0, %v73_v9  ;;  %v76_v13 = vmul.f32 -2.0, %v74_v11  ;;  %136 = dma.vmem_to_hbm [thread:$0]  %s132_s1, 128, %s134_s26, [#allocation9]  }
  0x15   :  { %v77_v14 = vmul.f32 1.442695, %v75_v12  ;;  %v79_v15 = vmul.f32 1.442695, %v76_v13 }
  0x17   :  { %158 = vpow2.f32 %v77_v14 }
  0x18   :  { %160 = vpow2.f32 %v79_v15 }
  0x1d   :  { %v159_v16 = vpop.eup %158 }
  0x1e   :  { %v161_v17 = vpop.eup %160  ;;  %v81_v18 = vadd.f32 1.0, %v159_v16  ;;  %v84_v19 = vmul.f32 -0.5, %v159_v16  ;;  %v87_v23 = vand.u32 2147483647, %v159_v16 }
  0x1f   :  { %v90_v20 = vadd.f32 1.0, %v161_v17  ;;  %v93_v21 = vmul.f32 -0.5, %v161_v17  ;;  %v96_v25 = vand.u32 2147483647, %v161_v17 }
  0x20   :  { %162 = vlog2.f32 %v81_v18  ;;  %v85_v22 = vadd.f32 1.0, %v84_v19  ;;  %vm88_vm2 = vcmp.lt.f32.partialorder %v87_v23, 0.0004427343 }
  0x21   :  { %164 = vlog2.f32 %v90_v20  ;;  %v94_v24 = vadd.f32 1.0, %v93_v21  ;;  %vm97_vm3 = vcmp.lt.f32.partialorder %v96_v25, 0.0004427343 }
  0x22   :  { %v86_v26 = vmul.f32 %v159_v16, %v85_v22 }
  0x23   :  { %v95_v28 = vmul.f32 %v161_v17, %v94_v24 }
  0x26   :  { %v163_v27 = vpop.eup %162 }
  0x27   :  { %v165_v29 = vpop.eup %164  ;;  %v83_v30 = vmul.f32 0.6931472, %v163_v27 }
  0x28   :  { %v92_v31 = vmul.f32 0.6931472, %v165_v29 }
  0x29   :  { %v89_v32 = vsel %vm88_vm2, %v86_v26, %v83_v30 }
  0x2a   :  { %v98_v33 = vsel %vm97_vm3, %v95_v28, %v92_v31  ;;  %v99_v34 = vadd.f32 %v89_v32, %v73_v9 }
  0x2b   :  { %v100_v35 = vadd.f32 %v98_v33, %v74_v11 }
  0x2c   :  { %v101_v36 = vsel %vm69_vm0, %v99_v34, 0.0 }
  0x2d   :  { %v102_v37 = vsel %vm70_vm1, %v100_v35, 0.0 }
  0x2e   :  { %v108_v38 = vadd.f32 %v102_v37, %v101_v36 }
  0x30   :  { %110 = vst [vmem:[#allocation7] sm:$0xff] %v108_v38 }
  0x31   :  { %125 = dma.vmem_to_hbm [thread:$0]  %s121_s27, 128, %s123_s30, [#allocation4]  }
  0x32   :  { %266 = dma.done.wait [#allocation4], 128  }
  0x33   :  { %267 = vsyncadd [#allocation4], 4294967168 }
  0x34   :  { %268 = dma.done.wait [#allocation9], 128  }
  0x35   :  { %269 = vsyncadd [#allocation9], 4294967168 }
  0x36   :  { %145 = vsyncpa [#allocation3], 1 }
  0x37   :  { %146 = vsyncpa [#allocation6], 1 }
  0x38   :  { %147 = vsyncpa [#allocation4], 1 }
  0x39   :  { %148 = vsyncpa [#allocation9], 1 }

</bundles_post_ra>
